<compile_context>
chip_gen: v5e
topology: v5e:2x2
jax: 0.10.0
libtpu: 0.0.40
codegen_flags: <defaults>
</compile_context>

<pallas_src>
import math

import jax
import jax.numpy as jnp
from jax.experimental import pallas as pl
from jax.experimental.pallas import tpu as pltpu

_LANE = 128
_SUB = 8


def _bce_dice_kernel(x_ref, t_ref, bce_ref, inter_ref, denom_ref):
    k = pl.program_id(1)

    @pl.when(k == 0)
    def _init():
        bce_ref[...] = jnp.zeros_like(bce_ref)
        inter_ref[...] = jnp.zeros_like(inter_ref)
        denom_ref[...] = jnp.zeros_like(denom_ref)

    # Cast narrow inputs to f32 right after load; all math/accumulation in f32.
    x = x_ref[...].astype(jnp.float32)      # (N, TILE_T, 128)
    t = t_ref[...].astype(jnp.float32)

    # Numerically stable BCE-with-logits: max(x,0) - x*t + log1p(exp(-|x|)).
    e = jnp.exp(-jnp.abs(x))                # single EUP exp, reused below
    bce_elem = jnp.maximum(x, 0.0) - x * t + jnp.log1p(e)

    # sigmoid(x) = 1/(1+e) if x >= 0 else e/(1+e) = 1 - 1/(1+e)
    a = 1.0 + e
    r = pl.reciprocal(a, approx=True)       # EUP slot (cheap)
    r = r * (2.0 - a * r)                   # Newton step 1 (VPU)
    r = r * (2.0 - a * r)                   # Newton step 2 -> full f32 accuracy
    s = jnp.where(x >= 0.0, r, 1.0 - r)

    # Per-(sample, lane) partial sums: only sublane/vreg folds here, the single
    # cross-lane (XLU) reduce is deferred to the tiny wrapper finalize.
    bce_ref[...] += jnp.sum(bce_elem, axis=1)
    inter_ref[...] += jnp.sum(s * t, axis=1)
    denom_ref[...] += jnp.sum(s + t, axis=1)


def bce_dice_loss(logits, target, *, max_tile_rows=None):
    """logits, target: (N, C, H, W) [any float dtype] -> scalar f32 loss."""
    assert logits.shape == target.shape
    n = logits.shape[0]
    d = math.prod(logits.shape[1:])

    x = logits.reshape(n, d)
    t = target.reshape(n, d)

    # ---- grid / tile sizing -------------------------------------------------
    t_raw = -(-d // _LANE)                           # 128-lane rows per sample
    p = 2 if t_raw >= 2 * _SUB else 1                # parallel chunks (v7x 2xTC)
    t_chunk = -(-t_raw // p)

    itemsize = max(x.dtype.itemsize, t.dtype.itemsize)
    budget = 10 * 1024 * 1024                        # 2 inputs x 2 pipeline bufs
    tile_t = budget // (4 * n * _LANE * itemsize)
    tile_t = max(_SUB, (min(tile_t, 2048) // _SUB) * _SUB)
    if max_tile_rows is not None:
        tile_t = max(_SUB, min(tile_t, (max_tile_rows // _SUB) * _SUB))
    tile_t = min(tile_t, -(-t_chunk // _SUB) * _SUB)
    k_steps = -(-t_chunk // tile_t)
    d_pad = p * k_steps * tile_t * _LANE

    # ---- padding (contributes exactly zero to every sum) --------------------
    if d_pad != d:
        x = jnp.pad(x, ((0, 0), (0, d_pad - d)), constant_values=-1e4)
        t = jnp.pad(t, ((0, 0), (0, d_pad - d)), constant_values=0)
    x3 = x.reshape(n, p * k_steps * tile_t, _LANE)
    t3 = t.reshape(n, p * k_steps * tile_t, _LANE)

    in_map = lambda pi, ki: (0, pi * k_steps + ki, 0)
    out_map = lambda pi, ki: (pi, 0, 0)

    out_shape = (
        jax.ShapeDtypeStruct((p, n, _LANE), jnp.float32),
        jax.ShapeDtypeStruct((p, n, _LANE), jnp.float32),
        jax.ShapeDtypeStruct((p, n, _LANE), jnp.float32),
    )
    out_specs = (
        pl.BlockSpec((None, n, _LANE), out_map),
        pl.BlockSpec((None, n, _LANE), out_map),
        pl.BlockSpec((None, n, _LANE), out_map),
    )

    block_in_bytes = n * tile_t * _LANE * (x3.dtype.itemsize + t3.dtype.itemsize)
    vmem_limit = int(min(32 * 1024 * 1024,
                         max(16 * 1024 * 1024,
                             2 * block_in_bytes + 6 * n * _LANE * 4 + (2 << 20))))

    cost = pl.CostEstimate(
        flops=10 * n * d_pad,
        transcendentals=2 * n * d_pad,
        bytes_accessed=(x3.size * x3.dtype.itemsize
                        + t3.size * t3.dtype.itemsize
                        + 3 * p * n * _LANE * 4),
    )

    bce_p, inter_p, denom_p = pl.pallas_call(
        _bce_dice_kernel,
        out_shape=out_shape,
        grid=(p, k_steps),
        in_specs=[
            pl.BlockSpec((n, tile_t, _LANE), in_map),
            pl.BlockSpec((n, tile_t, _LANE), in_map),
        ],
        out_specs=out_specs,
        compiler_params=pltpu.CompilerParams(
            dimension_semantics=("parallel", "arbitrary"),
            vmem_limit_bytes=vmem_limit,
        ),
        cost_estimate=cost,
    )(x3, t3)

    # ---- tiny finalize (O(N*128)): combine parallel chunks, one lane reduce,
    # dice ratio + BCE mean over the TRUE number of elements. -----------------
    smooth = 1e-5
    bce = jnp.sum(bce_p) / (n * d)
    inter = jnp.sum(inter_p, axis=(0, 2))            # (N,)
    denom = jnp.sum(denom_p, axis=(0, 2))            # (N,)
    dice = (2.0 * inter + smooth) / (denom + smooth)
    dice_loss = 1.0 - jnp.sum(dice) / n
    return 0.5 * bce + dice_loss


def _reference(logits, target):
    """Pure-JAX reference matching the PyTorch module semantics."""
    x = logits.astype(jnp.float32)
    t = target.astype(jnp.float32)
    bce = jnp.mean(jnp.maximum(x, 0.0) - x * t + jnp.log1p(jnp.exp(-jnp.abs(x))))
    smooth = 1e-5
    n = x.shape[0]
    s = jax.nn.sigmoid(x).reshape(n, -1)
    tt = t.reshape(n, -1)
    inter = jnp.sum(s * tt, axis=1)
    dice = (2.0 * inter + smooth) / (jnp.sum(s, axis=1) + jnp.sum(tt, axis=1) + smooth)
    dice = 1.0 - jnp.sum(dice) / n
    return 0.5 * bce + dice


if __name__ == "__main__":
    key = jax.random.PRNGKey(0)
    k1, k2, k3, k4, k5, k6 = jax.random.split(key, 6)

    # Case 1: small NCHW, D multiple of 128, single grid step.
    x1 = jax.random.normal(k1, (2, 4, 16, 16), dtype=jnp.float32)
    t1 = jax.random.uniform(k2, (2, 4, 16, 16), dtype=jnp.float32)
    out1 = jax.block_until_ready(bce_dice_loss(x1, t1))
    ref1 = jax.block_until_ready(_reference(x1, t1))
    assert jnp.allclose(out1, ref1, atol=1e-5, rtol=1e-5), (out1, ref1)

    # Case 2: ragged D (exercises padding) + both parallel chunks.
    x2 = jax.random.normal(k3, (2, 3, 32, 40), dtype=jnp.float32)
    t2 = (jax.random.uniform(k4, (2, 3, 32, 40)) > 0.5).astype(jnp.float32)
    out2 = jax.block_until_ready(bce_dice_loss(x2, t2))
    ref2 = jax.block_until_ready(_reference(x2, t2))
    assert jnp.allclose(out2, ref2, atol=1e-5, rtol=1e-5), (out2, ref2)

    # Case 3: multi-step reduction (k > 1) with native bf16 inputs.
    x3 = jax.random.normal(k5, (2, 4, 32, 32), dtype=jnp.bfloat16)
    t3 = jax.random.uniform(k6, (2, 4, 32, 32), dtype=jnp.bfloat16)
    out3 = jax.block_until_ready(bce_dice_loss(x3, t3, max_tile_rows=8))
    ref3 = jax.block_until_ready(_reference(x3, t3))
    assert jnp.allclose(out3, ref3, atol=1e-4, rtol=1e-4), (out3, ref3)

    print("KERNEL_OK")
</pallas_src>

<mosaic_0001>
module attributes {stable_mosaic.version = 11 : i64} {
  func.func @_bce_dice_kernel(%arg0: i32, %arg1: i32, %arg2: memref<2x8x128xf32, #tpu.memory_space<vmem>>, %arg3: memref<2x8x128xf32, #tpu.memory_space<vmem>>, %arg4: memref<1x2x128xf32, #tpu.memory_space<vmem>>, %arg5: memref<1x2x128xf32, #tpu.memory_space<vmem>>, %arg6: memref<1x2x128xf32, #tpu.memory_space<vmem>>) attributes {dimension_semantics = [#tpu.dimension_semantics<parallel>, #tpu.dimension_semantics<arbitrary>], iteration_bounds = array<i64: 1, 1>, scalar_prefetch = 0 : i64, scratch_operands = 0 : i64, tpu.core_type = #tpu.core_type<tc>, window_params = [{transform_indices = @transform_0, window_bounds = array<i64: 2, 8, 128>}, {transform_indices = @transform_1, window_bounds = array<i64: 2, 8, 128>}, {transform_indices = @transform_2, window_bounds = array<i64: 1, 2, 128>}, {transform_indices = @transform_3, window_bounds = array<i64: 1, 2, 128>}, {transform_indices = @transform_4, window_bounds = array<i64: 1, 2, 128>}]} {
    %c0_i32 = arith.constant 0 : i32
    %0 = arith.cmpi eq, %arg1, %c0_i32 : i32
    %1 = arith.extui %0 : i1 to i32
    %c0_i32_0 = arith.constant 0 : i32
    %2 = arith.cmpi ne, %1, %c0_i32_0 : i32
    scf.if %2 {
      %cst_33 = arith.constant 0.000000e+00 : f32
      %54 = vector.broadcast %cst_33 : f32 to vector<2x128xf32>
      %c0_34 = arith.constant 0 : index
      %c0_35 = arith.constant 0 : index
      %c0_36 = arith.constant 0 : index
      %55 = vector.load %arg4[%c0_34, %c0_35, %c0_36] : memref<1x2x128xf32, #tpu.memory_space<vmem>>, vector<1x2x128xf32>
      %56 = vector.shape_cast %55 : vector<1x2x128xf32> to vector<2x128xf32>
      %57 = vector.shape_cast %54 : vector<2x128xf32> to vector<1x2x128xf32>
      tpu.vector_store %arg4[%c0_34, %c0_35, %c0_36], %57 {strides = array<i32>} : memref<1x2x128xf32, #tpu.memory_space<vmem>>, vector<1x2x128xf32>,
      %cst_37 = arith.constant 0.000000e+00 : f32
      %58 = vector.broadcast %cst_37 : f32 to vector<2x128xf32>
      %c0_38 = arith.constant 0 : index
      %c0_39 = arith.constant 0 : index
      %c0_40 = arith.constant 0 : index
      %59 = vector.load %arg5[%c0_38, %c0_39, %c0_40] : memref<1x2x128xf32, #tpu.memory_space<vmem>>, vector<1x2x128xf32>
      %60 = vector.shape_cast %59 : vector<1x2x128xf32> to vector<2x128xf32>
      %61 = vector.shape_cast %58 : vector<2x128xf32> to vector<1x2x128xf32>
      tpu.vector_store %arg5[%c0_38, %c0_39, %c0_40], %61 {strides = array<i32>} : memref<1x2x128xf32, #tpu.memory_space<vmem>>, vector<1x2x128xf32>,
      %cst_41 = arith.constant 0.000000e+00 : f32
      %62 = vector.broadcast %cst_41 : f32 to vector<2x128xf32>
      %c0_42 = arith.constant 0 : index
      %c0_43 = arith.constant 0 : index
      %c0_44 = arith.constant 0 : index
      %63 = vector.load %arg6[%c0_42, %c0_43, %c0_44] : memref<1x2x128xf32, #tpu.memory_space<vmem>>, vector<1x2x128xf32>
      %64 = vector.shape_cast %63 : vector<1x2x128xf32> to vector<2x128xf32>
      %65 = vector.shape_cast %62 : vector<2x128xf32> to vector<1x2x128xf32>
      tpu.vector_store %arg6[%c0_42, %c0_43, %c0_44], %65 {strides = array<i32>} : memref<1x2x128xf32, #tpu.memory_space<vmem>>, vector<1x2x128xf32>,
    } else {
    }
    %c0 = arith.constant 0 : index
    %c0_1 = arith.constant 0 : index
    %c0_2 = arith.constant 0 : index
    %3 = vector.load %arg2[%c0, %c0_1, %c0_2] : memref<2x8x128xf32, #tpu.memory_space<vmem>>, vector<2x8x128xf32>
    %c0_3 = arith.constant 0 : index
    %c0_4 = arith.constant 0 : index
    %c0_5 = arith.constant 0 : index
    %4 = vector.load %arg3[%c0_3, %c0_4, %c0_5] : memref<2x8x128xf32, #tpu.memory_space<vmem>>, vector<2x8x128xf32>
    %5 = math.absf %3 : vector<2x8x128xf32>
    %cst = arith.constant 0.000000e+00 : f32
    %6 = vector.broadcast %cst : f32 to vector<2x8x128xf32>
    %7 = arith.subf %6, %5 : vector<2x8x128xf32>
    %8 = math.exp %7 : vector<2x8x128xf32>
    %cst_6 = arith.constant 0.000000e+00 : f32
    %9 = vector.broadcast %cst_6 : f32 to vector<2x8x128xf32>
    %10 = arith.maximumf %3, %9 : vector<2x8x128xf32>
    %11 = arith.mulf %3, %4 : vector<2x8x128xf32>
    %12 = arith.subf %10, %11 : vector<2x8x128xf32>
    %13 = math.log1p %8 : vector<2x8x128xf32>
    %14 = arith.addf %12, %13 : vector<2x8x128xf32>
    %cst_7 = arith.constant 1.000000e+00 : f32
    %15 = vector.broadcast %cst_7 : f32 to vector<2x8x128xf32>
    %16 = arith.addf %15, %8 : vector<2x8x128xf32>
    %17 = tpu.reciprocal %16 {approx = true} : vector<2x8x128xf32> -> vector<2x8x128xf32>
    %18 = arith.mulf %16, %17 : vector<2x8x128xf32>
    %cst_8 = arith.constant 2.000000e+00 : f32
    %19 = vector.broadcast %cst_8 : f32 to vector<2x8x128xf32>
    %20 = arith.subf %19, %18 : vector<2x8x128xf32>
    %21 = arith.mulf %17, %20 : vector<2x8x128xf32>
    %22 = arith.mulf %16, %21 : vector<2x8x128xf32>
    %cst_9 = arith.constant 2.000000e+00 : f32
    %23 = vector.broadcast %cst_9 : f32 to vector<2x8x128xf32>
    %24 = arith.subf %23, %22 : vector<2x8x128xf32>
    %25 = arith.mulf %21, %24 : vector<2x8x128xf32>
    %cst_10 = arith.constant 0.000000e+00 : f32
    %26 = vector.broadcast %cst_10 : f32 to vector<2x8x128xf32>
    %27 = arith.cmpf oge, %3, %26 : vector<2x8x128xf32>
    %cst_11 = arith.constant 1.000000e+00 : f32
    %28 = vector.broadcast %cst_11 : f32 to vector<2x8x128xf32>
    %29 = arith.subf %28, %25 : vector<2x8x128xf32>
    %30 = arith.select %27, %25, %29 : vector<2x8x128xi1>, vector<2x8x128xf32>
    %c0_12 = arith.constant 0 : index
    %c0_13 = arith.constant 0 : index
    %c0_14 = arith.constant 0 : index
    %31 = vector.load %arg4[%c0_12, %c0_13, %c0_14] : memref<1x2x128xf32, #tpu.memory_space<vmem>>, vector<1x2x128xf32>
    %32 = vector.shape_cast %31 : vector<1x2x128xf32> to vector<2x128xf32>
    %cst_15 = arith.constant dense<0.000000e+00> : vector<2x128xf32>
    %33 = vector.multi_reduction <add>, %14, %cst_15 [1] : vector<2x8x128xf32> to vector<2x128xf32>
    %34 = arith.addf %32, %33 : vector<2x128xf32>
    %c0_16 = arith.constant 0 : index
    %c0_17 = arith.constant 0 : index
    %c0_18 = arith.constant 0 : index
    %35 = vector.load %arg4[%c0_16, %c0_17, %c0_18] : memref<1x2x128xf32, #tpu.memory_space<vmem>>, vector<1x2x128xf32>
    %36 = vector.shape_cast %35 : vector<1x2x128xf32> to vector<2x128xf32>
    %37 = vector.shape_cast %34 : vector<2x128xf32> to vector<1x2x128xf32>
    tpu.vector_store %arg4[%c0_16, %c0_17, %c0_18], %37 {strides = array<i32>} : memref<1x2x128xf32, #tpu.memory_space<vmem>>, vector<1x2x128xf32>,
    %c0_19 = arith.constant 0 : index
    %c0_20 = arith.constant 0 : index
    %c0_21 = arith.constant 0 : index
    %38 = vector.load %arg5[%c0_19, %c0_20, %c0_21] : memref<1x2x128xf32, #tpu.memory_space<vmem>>, vector<1x2x128xf32>
    %39 = vector.shape_cast %38 : vector<1x2x128xf32> to vector<2x128xf32>
    %40 = arith.mulf %30, %4 : vector<2x8x128xf32>
    %cst_22 = arith.constant dense<0.000000e+00> : vector<2x128xf32>
    %41 = vector.multi_reduction <add>, %40, %cst_22 [1] : vector<2x8x128xf32> to vector<2x128xf32>
    %42 = arith.addf %39, %41 : vector<2x128xf32>
    %c0_23 = arith.constant 0 : index
    %c0_24 = arith.constant 0 : index
    %c0_25 = arith.constant 0 : index
    %43 = vector.load %arg5[%c0_23, %c0_24, %c0_25] : memref<1x2x128xf32, #tpu.memory_space<vmem>>, vector<1x2x128xf32>
    %44 = vector.shape_cast %43 : vector<1x2x128xf32> to vector<2x128xf32>
    %45 = vector.shape_cast %42 : vector<2x128xf32> to vector<1x2x128xf32>
    tpu.vector_store %arg5[%c0_23, %c0_24, %c0_25], %45 {strides = array<i32>} : memref<1x2x128xf32, #tpu.memory_space<vmem>>, vector<1x2x128xf32>,
    %c0_26 = arith.constant 0 : index
    %c0_27 = arith.constant 0 : index
    %c0_28 = arith.constant 0 : index
    %46 = vector.load %arg6[%c0_26, %c0_27, %c0_28] : memref<1x2x128xf32, #tpu.memory_space<vmem>>, vector<1x2x128xf32>
    %47 = vector.shape_cast %46 : vector<1x2x128xf32> to vector<2x128xf32>
    %48 = arith.addf %30, %4 : vector<2x8x128xf32>
    %cst_29 = arith.constant dense<0.000000e+00> : vector<2x128xf32>
    %49 = vector.multi_reduction <add>, %48, %cst_29 [1] : vector<2x8x128xf32> to vector<2x128xf32>
    %50 = arith.addf %47, %49 : vector<2x128xf32>
    %c0_30 = arith.constant 0 : index
    %c0_31 = arith.constant 0 : index
    %c0_32 = arith.constant 0 : index
    %51 = vector.load %arg6[%c0_30, %c0_31, %c0_32] : memref<1x2x128xf32, #tpu.memory_space<vmem>>, vector<1x2x128xf32>
    %52 = vector.shape_cast %51 : vector<1x2x128xf32> to vector<2x128xf32>
    %53 = vector.shape_cast %50 : vector<2x128xf32> to vector<1x2x128xf32>
    tpu.vector_store %arg6[%c0_30, %c0_31, %c0_32], %53 {strides = array<i32>} : memref<1x2x128xf32, #tpu.memory_space<vmem>>, vector<1x2x128xf32>,
    return
  }
  func.func @transform_0(%arg0: i32, %arg1: i32) -> (i32, i32, i32) {
    %c1_i32 = arith.constant 1 : i32
    %0 = arith.muli %arg0, %c1_i32 : i32
    %1 = arith.addi %0, %arg1 : i32
    %c0_i32 = arith.constant 0 : i32
    %c0_i32_0 = arith.constant 0 : i32
    %c0_i32_1 = arith.constant 0 : i32
    return %c0_i32, %1, %c0_i32_0 : i32, i32, i32
  }
  func.func @transform_1(%arg0: i32, %arg1: i32) -> (i32, i32, i32) {
    %c1_i32 = arith.constant 1 : i32
    %0 = arith.muli %arg0, %c1_i32 : i32
    %1 = arith.addi %0, %arg1 : i32
    %c0_i32 = arith.constant 0 : i32
    %c0_i32_0 = arith.constant 0 : i32
    %c0_i32_1 = arith.constant 0 : i32
    return %c0_i32, %1, %c0_i32_0 : i32, i32, i32
  }
  func.func @transform_2(%arg0: i32, %arg1: i32) -> (i32, i32, i32) {
    %c0_i32 = arith.constant 0 : i32
    %c0_i32_0 = arith.constant 0 : i32
    %c0_i32_1 = arith.constant 0 : i32
    return %arg0, %c0_i32, %c0_i32_0 : i32, i32, i32
  }
  func.func @transform_3(%arg0: i32, %arg1: i32) -> (i32, i32, i32) {
    %c0_i32 = arith.constant 0 : i32
    %c0_i32_0 = arith.constant 0 : i32
    %c0_i32_1 = arith.constant 0 : i32
    return %arg0, %c0_i32, %c0_i32_0 : i32, i32, i32
  }
  func.func @transform_4(%arg0: i32, %arg1: i32) -> (i32, i32, i32) {
    %c0_i32 = arith.constant 0 : i32
    %c0_i32_0 = arith.constant 0 : i32
    %c0_i32_1 = arith.constant 0 : i32
    return %arg0, %c0_i32, %c0_i32_0 : i32, i32, i32
  }
}

</mosaic_0001>

<bundles_post_ra>
// kernel: tpu_custom_call.1
= control target key start
LH: loop header
LB: loop body
LE: loop exit
PB: predicated region body
PF: predicated region fallthrough
CT: control target
= control target key end

     0   :  { %10 = vsyncpa [#allocation3], 0  ;;  %s445_s0 = inlined_call_operand.hbm [shape: f32[2,8,128], index: 0, kind: input, shape index: {}]   ;;  %s446_s1 = inlined_call_operand.hbm [shape: f32[2,8,128], index: 1, kind: input, shape index: {}]   ;;  %s447_s2 = inlined_call_operand.hbm [shape: f32[1,2,128], index: 2, kind: output, shape index: {0}]   ;;  %s448_s3 = inlined_call_operand.hbm [shape: f32[1,2,128], index: 3, kind: output, shape index: {1}]   ;;  %s449_s4 = inlined_call_operand.hbm [shape: f32[1,2,128], index: 4, kind: output, shape index: {2}]  }
   0x1   :  { %11 = vsyncpa [#allocation6], 0 }
   0x2   :  { %12 = vsyncpa [#allocation4], 0 }
   0x3   :  { %13 = vsyncpa [#allocation9], 0  ;;  %s21_s17 = sshll.u32 %s445_s0, 4  ;;  %s382_s18 = smov [#allocation2]   ;;  %s22_s17 = int_to_ptr.hbm [resolvable:$true] %s21_s17 }
   0x4   :  { %s23_s19 = sshll.u32 %s382_s18, 4  ;;  %s37_s22 = sshll.u32 %s446_s1, 4  ;;  %s24_s19 = int_to_ptr.vmem [resolvable:$true] %s23_s19  ;;  %s38_s22 = int_to_ptr.hbm [resolvable:$true] %s37_s22 }
   0x5   :  { %s383_s23 = smov 128   ;;  %s384_s24 = smov 8  }
   0x6   :  { %29 = dma.hbm_to_vmem [thread:$0]  %s22_s17, 256, %s24_s19, [#allocation3], %s383_s23, %s383_s23, %s384_s24  }
   0x7   :  { %s385_s25 = smov [#allocation5]  }
   0x8   :  { %s39_s26 = sshll.u32 %s385_s25, 4  ;;  %s40_s26 = int_to_ptr.vmem [resolvable:$true] %s39_s26 }
   0x9   :  { %45 = dma.hbm_to_vmem [thread:$0]  %s38_s22, 256, %s40_s26, [#allocation6], %s383_s23, %s383_s23, %s384_s24  }
   0xa   :  { %374 = dma.done.wait [#allocation3], 256  }
   0xb   :  { %375 = vsyncadd [#allocation3], 4294967040 }
   0xc   :  { %376 = dma.done.wait [#allocation6], 256  }
   0xd   :  { %377 = vsyncadd [#allocation6], 4294967040  ;;  %v386_v0 = vmov 0.0   ;;  %v421_v1 = vld [vmem:[#allocation2] sm:$0xff]  ;;  %v423_v2 = vld [vmem:[#allocation2 + $0x8] sm:$0xff]  ;;  %vm138_vm4 = vcmask 1041409  }
   0xe   :  { %61 = vst [vmem:[#allocation8] sm:$0x3] %v386_v0  ;;  %v67_v3 = vand.u32 2147483647, %v421_v1  ;;  %v68_v4 = vand.u32 2147483647, %v423_v2 }
   0xf   :  { %60 = vst [vmem:[#allocation7] sm:$0x3] %v386_v0  ;;  %v65_v15 = vld [vmem:[#allocation5] sm:$0xff]  ;;  %v66_v16 = vld [vmem:[#allocation5 + $0x8] sm:$0xff]  ;;  %v75_v18 = vmax.f32 %v421_v1, 0.0  ;;  %v76_v22 = vmax.f32 %v423_v2, 0.0 }
  0x10   :  { %62 = vst [vmem:[#allocation10] sm:$0x3] %v386_v0  ;;  %v69_v5 = vsub.f32 0.0, %v67_v3  ;;  %v70_v6 = vsub.f32 0.0, %v68_v4  ;;  %v77_v19 = vmul.f32 %v65_v15, %v421_v1  ;;  %v78_v23 = vmul.f32 %v66_v16, %v423_v2  ;;  %s387_s0 = smov [#allocation7]   ;;  %s192_s29 = sshll.u32 %s447_s2, 4  ;;  %s193_s29 = int_to_ptr.hbm [resolvable:$true] %s192_s29 }
  0x11   :  { %vm117_vm2 = vcmp.ge.f32.partialorder %v421_v1, 0.0  ;;  %vm118_vm3 = vcmp.ge.f32.partialorder %v423_v2, 0.0  ;;  %s190_s1 = sshll.u32 %s387_s0, 4  ;;  %s388_s2 = smov [#allocation8]   ;;  %s191_s1 = int_to_ptr.vmem [resolvable:$true] %s190_s1 }
  0x12   :  { %v71_v7 = vmul.f32 1.442695, %v69_v5  ;;  %v73_v8 = vmul.f32 1.442695, %v70_v6  ;;  %v79_v31 = vsub.f32 %v75_v18, %v77_v19  ;;  %v80_v35 = vsub.f32 %v76_v22, %v78_v23  ;;  %s201_s30 = sshll.u32 %s388_s2, 4  ;;  %s203_s7 = sshll.u32 %s448_s3, 4  ;;  %s202_s30 = int_to_ptr.vmem [resolvable:$true] %s201_s30  ;;  %s204_s7 = int_to_ptr.hbm [resolvable:$true] %s203_s7 }
  0x13   :  { %s389_s8 = smov [#allocation10]   ;;  %s214_s12 = sshll.u32 %s449_s4, 4  ;;  %s215_s12 = int_to_ptr.hbm [resolvable:$true] %s214_s12 }
  0x14   :  { %242 = vpow2.f32 %v71_v7  ;;  %s212_s9 = sshll.u32 %s389_s8, 4  ;;  %s213_s9 = int_to_ptr.vmem [resolvable:$true] %s212_s9 }
  0x15   :  { %244 = vpow2.f32 %v73_v8 }
  0x1a   :  { %v243_v9 = vpop.eup %242 }
  0x1b   :  { %v245_v10 = vpop.eup %244  ;;  %v81_v11 = vadd.f32 1.0, %v243_v9  ;;  %v84_v13 = vmul.f32 -0.5, %v243_v9  ;;  %v87_v20 = vand.u32 2147483647, %v243_v9 }
  0x1c   :  { %v90_v12 = vadd.f32 1.0, %v245_v10  ;;  %v93_v14 = vmul.f32 -0.5, %v245_v10  ;;  %v96_v24 = vand.u32 2147483647, %v245_v10 }
  0x1d   :  { %246 = vrcp.f32 %v81_v11  ;;  %v85_v17 = vadd.f32 1.0, %v84_v13  ;;  %vm88_vm0 = vcmp.lt.f32.partialorder %v87_v20, 0.0004427343 }
  0x1e   :  { %248 = vrcp.f32 %v90_v12  ;;  %v94_v21 = vadd.f32 1.0, %v93_v14  ;;  %vm97_vm1 = vcmp.lt.f32.partialorder %v96_v24, 0.0004427343 }
  0x1f   :  { %250 = vlog2.f32 %v81_v11  ;;  %v86_v28 = vmul.f32 %v243_v9, %v85_v17 }
  0x20   :  { %252 = vlog2.f32 %v90_v12  ;;  %v95_v32 = vmul.f32 %v245_v10, %v94_v21  ;;  %v123_v10 = vld [vmem:[#allocation7] sm:$0x3] }
  0x23   :  { %v247_v25 = vpop.eup %246 }
  0x24   :  { %v249_v26 = vpop.eup %248  ;;  %v105_v27 = vmul.f32 %v247_v25, %v81_v11 }
  0x25   :  { %v251_v29 = vpop.eup %250  ;;  %v106_v30 = vmul.f32 %v249_v26, %v90_v12 }
  0x26   :  { %v253_v33 = vpop.eup %252  ;;  %v107_v34 = vsub.f32 2.0, %v105_v27  ;;  %v83_v36 = vmul.f32 0.6931472, %v251_v29 }
  0x27   :  { %v108_v37 = vsub.f32 2.0, %v106_v30  ;;  %v92_v38 = vmul.f32 0.6931472, %v253_v33 }
  0x28   :  { %v109_v39 = vmul.f32 %v247_v25, %v107_v34  ;;  %v89_v40 = vsel %vm88_vm0, %v86_v28, %v83_v36  ;;  %v164_v34 = vld [vmem:[#allocation10] sm:$0x3] }
  0x29   :  { %v110_v41 = vmul.f32 %v249_v26, %v108_v37  ;;  %v98_v42 = vsel %vm97_vm1, %v95_v32, %v92_v38  ;;  %v99_v43 = vadd.f32 %v89_v40, %v79_v31  ;;  %v143_v32 = vld [vmem:[#allocation8] sm:$0x3] }
  0x2a   :  { %v111_v44 = vmul.f32 %v109_v39, %v81_v11  ;;  %v100_v45 = vadd.f32 %v98_v42, %v80_v35 }
  0x2b   :  { %v112_v46 = vmul.f32 %v110_v41, %v90_v12  ;;  %v124_v47 = vrot.slane %v99_v43, 4 }
  0x2c   :  { %v113_v48 = vsub.f32 2.0, %v111_v44  ;;  %v130_v49 = vrot.slane %v100_v45, 4 }
  0x2d   :  { %v114_v50 = vsub.f32 2.0, %v112_v46  ;;  %v125_v51 = vadd.f32 %v124_v47, %v99_v43 }
  0x2e   :  { %v115_v52 = vmul.f32 %v113_v48, %v109_v39  ;;  %v131_v53 = vadd.f32 %v130_v49, %v100_v45 }
  0x2f   :  { %v116_v54 = vmul.f32 %v114_v50, %v110_v41  ;;  %v126_v55 = vrot.slane %v125_v51, 2 }
  0x30   :  { %v119_v56 = vsub.f32 1.0, %v115_v52  ;;  %v132_v57 = vrot.slane %v131_v53, 2 }
  0x31   :  { %v120_v58 = vsub.f32 1.0, %v116_v54  ;;  %v127_v59 = vadd.f32 %v126_v55, %v125_v51 }
  0x32   :  { %v121_v60 = vsel %vm117_vm2, %v115_v52, %v119_v56  ;;  %v133_v61 = vadd.f32 %v132_v57, %v131_v53 }
  0x33   :  { %v122_v62 = vsel %vm118_vm3, %v116_v54, %v120_v58  ;;  %v144_v63 = vmul.f32 %v121_v60, %v65_v15  ;;  %v128_v0 = vrot.slane %v127_v59, 1  ;;  %v165_v3 = vadd.f32 %v121_v60, %v65_v15 }
  0x34   :  { %v145_v4 = vmul.f32 %v122_v62, %v66_v16  ;;  %v134_v5 = vrot.slane %v133_v61, 1  ;;  %v166_v6 = vadd.f32 %v122_v62, %v66_v16 }
  0x35   :  { %v146_v7 = vrot.slane %v144_v63, 4  ;;  %v129_v8 = vadd.f32 %v128_v0, %v127_v59  ;;  %v167_v1 = vrot.slane %v165_v3, 4 }
  0x36   :  { %v152_v9 = vrot.slane %v145_v4, 4  ;;  %v135_v2 = vadd.f32 %v134_v5, %v133_v61  ;;  %v173_v11 = vrot.slane %v166_v6, 4 }
  0x37   :  { %v147_v12 = vadd.f32 %v146_v7, %v144_v63  ;;  %v168_v13 = vadd.f32 %v167_v1, %v165_v3 }
  0x38   :  { %v153_v14 = vadd.f32 %v152_v9, %v145_v4  ;;  %v139_v15 = vsel %vm138_vm4, %v135_v2, %v129_v8  ;;  %v174_v16 = vadd.f32 %v173_v11, %v166_v6 }
  0x39   :  { %v148_v17 = vrot.slane %v147_v12, 2  ;;  %v141_v18 = vadd.f32 %v139_v15, %v123_v10  ;;  %v169_v19 = vrot.slane %v168_v13, 2 }
  0x3a   :  { %v154_v20 = vrot.slane %v153_v14, 2  ;;  %v175_v21 = vrot.slane %v174_v16, 2 }
  0x3b   :  { %v149_v22 = vadd.f32 %v148_v17, %v147_v12  ;;  %142 = vst [vmem:[#allocation7] sm:$0x3] %v141_v18  ;;  %v170_v23 = vadd.f32 %v169_v19, %v168_v13 }
  0x3c   :  { %v155_v24 = vadd.f32 %v154_v20, %v153_v14  ;;  %v176_v25 = vadd.f32 %v175_v21, %v174_v16  ;;  %195 = dma.vmem_to_hbm [thread:$0]  %s191_s1, 32, %s193_s29, [#allocation4]  }
  0x3d   :  { %v150_v26 = vrot.slane %v149_v22, 1  ;;  %v171_v27 = vrot.slane %v170_v23, 1 }
  0x3e   :  { %v156_v28 = vrot.slane %v155_v24, 1  ;;  %v177_v29 = vrot.slane %v176_v25, 1 }
  0x3f   :  { %v151_v30 = vadd.f32 %v150_v26, %v149_v22  ;;  %v172_v31 = vadd.f32 %v171_v27, %v170_v23 }
  0x40   :  { %v157_v33 = vadd.f32 %v156_v28, %v155_v24  ;;  %v178_v35 = vadd.f32 %v177_v29, %v176_v25 }
  0x42   :  { %v160_v36 = vsel %vm138_vm4, %v157_v33, %v151_v30  ;;  %v181_v37 = vsel %vm138_vm4, %v178_v35, %v172_v31 }
  0x43   :  { %v162_v38 = vadd.f32 %v160_v36, %v143_v32  ;;  %v183_v39 = vadd.f32 %v181_v37, %v164_v34 }
  0x45   :  { %163 = vst [vmem:[#allocation8] sm:$0x3] %v162_v38 }
  0x46   :  { %184 = vst [vmem:[#allocation10] sm:$0x3] %v183_v39  ;;  %206 = dma.vmem_to_hbm [thread:$0]  %s202_s30, 32, %s204_s7, [#allocation9]  }
  0x47   :  { %217 = dma.vmem_to_hbm [thread:$0]  %s213_s9, 32, %s215_s12, [#allocation9]  }
  0x48   :  { %378 = dma.done.wait [#allocation4], 32  }
  0x49   :  { %379 = vsyncadd [#allocation4], 4294967264 }
  0x4a   :  { %380 = dma.done.wait [#allocation9], 64  }
  0x4b   :  { %381 = vsyncadd [#allocation9], 4294967232 }
  0x4c   :  { %230 = vsyncpa [#allocation3], 1 }
  0x4d   :  { %231 = vsyncpa [#allocation6], 1 }
  0x4e   :  { %232 = vsyncpa [#allocation4], 1 }
  0x4f   :  { %233 = vsyncpa [#allocation9], 1 }

</bundles_post_ra>
